<compile_context>
chip_gen: v7x
topology: tpu7x:2x2x1
jax: 0.10.0
libtpu: 0.0.40
codegen_flags: <defaults>
</compile_context>

<pallas_src>
from typing import NamedTuple, Optional

import jax
import jax.numpy as jnp
from jax.experimental import pallas as pl
from jax.experimental.pallas import tpu as pltpu

LANE = 128
SUBLANE = 8

# Budgets chosen for the smallest chip (v7x: 64 MiB physical VMEM per TC).
_VMEM_CAP_BYTES = 48 * 1024 * 1024      # scoped-VMEM request ceiling (v7x-safe)
_VMEM_FLOOR_BYTES = 8 * 1024 * 1024     # leave room for compiler scratch
_SIMPLE_PATH_BUDGET = 40 * 1024 * 1024  # resident-W path must fit in this


def _cdiv(a: int, b: int) -> int:
    return (a + b - 1) // b


def _round_up(x: int, m: int) -> int:
    return _cdiv(x, m) * m


# ---------------------------------------------------------------------------
# Kernels
# ---------------------------------------------------------------------------
def _linear_kernel_bias(x_ref, w_ref, b_ref, o_ref):
    # x: (tm, Cin), w: (Cin, Cout_pad) [VMEM-resident], b: (1, Cout_pad) f32.
    acc = jnp.dot(x_ref[...], w_ref[...], preferred_element_type=jnp.float32)
    o_ref[...] = (acc + b_ref[...]).astype(o_ref.dtype)


def _linear_kernel_nobias(x_ref, w_ref, o_ref):
    acc = jnp.dot(x_ref[...], w_ref[...], preferred_element_type=jnp.float32)
    o_ref[...] = acc.astype(o_ref.dtype)


def _linear_tiled_kernel_bias(x_ref, w_ref, b_ref, o_ref, acc_ref):
    # Grid (m, n, k); k is the reduction axis ("arbitrary", innermost).
    k = pl.program_id(2)

    @pl.when(k == 0)
    def _():
        acc_ref[...] = jnp.zeros_like(acc_ref)

    acc_ref[...] += jnp.dot(x_ref[...], w_ref[...],
                            preferred_element_type=jnp.float32)

    @pl.when(k == pl.num_programs(2) - 1)
    def _():
        o_ref[...] = (acc_ref[...] + b_ref[...]).astype(o_ref.dtype)


def _linear_tiled_kernel_nobias(x_ref, w_ref, o_ref, acc_ref):
    k = pl.program_id(2)

    @pl.when(k == 0)
    def _():
        acc_ref[...] = jnp.zeros_like(acc_ref)

    acc_ref[...] += jnp.dot(x_ref[...], w_ref[...],
                            preferred_element_type=jnp.float32)

    @pl.when(k == pl.num_programs(2) - 1)
    def _():
        o_ref[...] = acc_ref[...].astype(o_ref.dtype)


# ---------------------------------------------------------------------------
# One-time parameter preparation (hoisted out of the per-call path)
# ---------------------------------------------------------------------------
class PreparedLinear(NamedTuple):
    wt: jax.Array                 # (K_pad, Cout_pad), matmul dtype
    bias: Optional[jax.Array]     # (1, Cout_pad) f32, or None
    in_features: int
    out_features: int
    tiled: bool                   # True -> K/N-tiled kernel path


def prepare_linear_params(weight, bias=None, *, matmul_dtype=jnp.bfloat16,
                          force_tiled=False) -> PreparedLinear:
    """Transpose/pad/cast the weight once (parameter-load time).

    weight: (Cout, Cin)  (PyTorch nn.Linear layout), bias: (Cout,) or None.
    """
    Cout, Cin = weight.shape
    Cout_pad = _round_up(Cout, LANE)           # lane-dense output stores
    isz = jnp.dtype(matmul_dtype).itemsize

    # Resident-W path viability: double-buffered W + streamed x/out tiles at
    # tm=256 must fit a v7x-safe budget; otherwise use the K/N-tiled path.
    w_resident = 2 * Cin * Cout_pad * isz
    tiles_256 = 2 * 256 * Cin * isz + 2 * 256 * Cout_pad * 4
    tiled = force_tiled or (w_resident + tiles_256) > _SIMPLE_PATH_BUDGET

    # In the tiled path the reduction axis is tiled, so pad Cin to a multiple
    # of 128 (zeros) to avoid reading undefined out-of-bounds data in K.
    K_pad = _round_up(Cin, LANE) if tiled else Cin

    wt = weight.T.astype(matmul_dtype)         # (Cin, Cout)
    if K_pad != Cin or Cout_pad != Cout:
        wt = jnp.pad(wt, ((0, K_pad - Cin), (0, Cout_pad - Cout)))

    b = None
    if bias is not None:
        b = bias.astype(jnp.float32)
        if Cout_pad != Cout:
            b = jnp.pad(b, (0, Cout_pad - Cout))
        b = b.reshape(1, Cout_pad)

    return PreparedLinear(wt, b, int(Cin), int(Cout), bool(tiled))


# ---------------------------------------------------------------------------
# Forward
# ---------------------------------------------------------------------------
def linear_forward(x, weight, bias=None, *, use_bf16_matmul=True, tm_max=512):
    """nn.Linear forward: y = x @ weight.T + bias.

    `weight` may be a raw (Cout, Cin) array or a PreparedLinear (preferred:
    prepare once so transpose/pad/cast is not paid every call).
    """
    if isinstance(weight, PreparedLinear):
        params = weight
        assert bias is None, "bias is baked into PreparedLinear"
    else:
        params = prepare_linear_params(
            weight, bias,
            matmul_dtype=jnp.bfloat16 if use_bf16_matmul else jnp.float32)
    return _linear_forward_prepared(x, params, tm_max=tm_max)


def _linear_forward_prepared(x, params: PreparedLinear, *, tm_max=512):
    orig_dtype = x.dtype
    lead = x.shape[:-1]
    Cin = x.shape[-1]
    assert Cin == params.in_features, "input feature dim mismatch"
    Cout = params.out_features
    wt, b = params.wt, params.bias
    K_pad, Cout_pad = wt.shape
    mm_dtype = wt.dtype
    in_isz = jnp.dtype(mm_dtype).itemsize
    out_isz = jnp.dtype(orig_dtype).itemsize

    M = 1
    for d in lead:
        M *= int(d)

    x2 = x.reshape(M, Cin).astype(mm_dtype)
    if K_pad != Cin:
        # Rare (tiled path with Cin not a multiple of 128): zero-pad K so the
        # K reduction never folds in undefined out-of-bounds data.
        x2 = jnp.pad(x2, ((0, 0), (0, K_pad - Cin)))

    cost = pl.CostEstimate(
        flops=2 * M * K_pad * Cout_pad,
        transcendentals=0,
        bytes_accessed=(M * K_pad * in_isz + K_pad * Cout_pad * in_isz
                        + M * Cout_pad * out_isz
                        + (Cout_pad * 4 if b is not None else 0)),
    )

    if not params.tiled:
        out = _simple_call(x2, wt, b, M, K_pad, Cout_pad, orig_dtype,
                           tm_max, cost, in_isz, out_isz)
    else:
        out = _tiled_call(x2, wt, b, M, K_pad, Cout_pad, orig_dtype,
                          tm_max, cost, in_isz, out_isz)

    if Cout_pad != Cout:
        out = out[:, :Cout]
    return out.reshape(*lead, Cout)


def _simple_call(x2, wt, b, M, Cin, Cout_pad, out_dtype, tm_max, cost,
                 in_isz, out_isz):
    """Resident-W path: grid over row tiles only; W and bias stay in VMEM."""
    fixed = 2 * Cin * Cout_pad * in_isz            # W (double-buffer-safe)
    if b is not None:
        fixed += 2 * 2 * Cout_pad * 4              # bias
    per_row = 2 * Cin * in_isz + 2 * Cout_pad * out_isz   # streamed x + out

    tm_fit = max(SUBLANE,
                 ((_VMEM_CAP_BYTES - fixed) // max(per_row, 1)) // SUBLANE * SUBLANE)
    tm = min(tm_max, _round_up(M, SUBLANE), tm_fit)
    # Guarantee >=2 parallel grid steps when possible (v7x has 2 TensorCores).
    if M > SUBLANE and _cdiv(M, tm) == 1:
        tm = _round_up(_cdiv(M, 2), SUBLANE)
    grid_m = _cdiv(M, tm)

    vmem_bytes = int(min(_VMEM_CAP_BYTES,
                         max(_VMEM_FLOOR_BYTES,
                             fixed + tm * per_row + (1 << 20))))

    in_specs = [
        pl.BlockSpec((tm, Cin), lambda i: (i, 0)),           # streamed
        pl.BlockSpec((Cin, Cout_pad), lambda i: (0, 0)),     # VMEM-resident
    ]
    args = [x2, wt]
    if b is not None:
        in_specs.append(pl.BlockSpec((1, Cout_pad), lambda i: (0, 0)))
        args.append(b)
        kernel = _linear_kernel_bias
    else:
        kernel = _linear_kernel_nobias

    return pl.pallas_call(
        kernel,
        out_shape=jax.ShapeDtypeStruct((M, Cout_pad), out_dtype),
        grid=(grid_m,),
        in_specs=in_specs,
        out_specs=pl.BlockSpec((tm, Cout_pad), lambda i: (i, 0)),
        compiler_params=pltpu.CompilerParams(
            dimension_semantics=("parallel",),
            vmem_limit_bytes=vmem_bytes,
        ),
        cost_estimate=cost,
    )(*args)


def _tiled_call(x2, wt, b, M, K_pad, Cout_pad, out_dtype, tm_max, cost,
                in_isz, out_isz):
    """Large-weight path: (M, N, K) grid with f32 accumulator scratch."""
    tm = min(tm_max, _round_up(M, SUBLANE))
    tn = 256 if Cout_pad % 256 == 0 else LANE
    tk = LANE
    for cand in (512, 256, LANE):
        if K_pad % cand == 0:
            tk = cand
            break
    grid = (_cdiv(M, tm), Cout_pad // tn, K_pad // tk)

    vmem_bytes = (2 * tm * tk * in_isz + 2 * tk * tn * in_isz
                  + 2 * tm * tn * out_isz + tm * tn * 4)
    if b is not None:
        vmem_bytes += 2 * 2 * tn * 4
    vmem_bytes = int(min(_VMEM_CAP_BYTES,
                         max(_VMEM_FLOOR_BYTES, vmem_bytes + (1 << 20))))

    in_specs = [
        pl.BlockSpec((tm, tk), lambda i, j, k: (i, k)),
        pl.BlockSpec((tk, tn), lambda i, j, k: (k, j)),
    ]
    args = [x2, wt]
    if b is not None:
        in_specs.append(pl.BlockSpec((1, tn), lambda i, j, k: (0, j)))
        args.append(b)
        kernel = _linear_tiled_kernel_bias
    else:
        kernel = _linear_tiled_kernel_nobias

    return pl.pallas_call(
        kernel,
        out_shape=jax.ShapeDtypeStruct((M, Cout_pad), out_dtype),
        grid=grid,
        in_specs=in_specs,
        out_specs=pl.BlockSpec((tm, tn), lambda i, j, k: (i, j)),
        scratch_shapes=[pltpu.VMEM((tm, tn), jnp.float32)],
        compiler_params=pltpu.CompilerParams(
            dimension_semantics=("parallel", "parallel", "arbitrary"),
            vmem_limit_bytes=vmem_bytes,
        ),
        cost_estimate=cost,
    )(*args)


# ---------------------------------------------------------------------------
# Reference + init helpers
# ---------------------------------------------------------------------------
def linear_reference(x, weight, bias=None):
    y = jnp.matmul(x, weight.T)
    if bias is not None:
        y = y + bias
    return y


def xavier_normal(key, shape, dtype=jnp.float32):
    # PyTorch Linear weight layout: (out_channels, in_channels)
    fan_out, fan_in = shape
    std = (2.0 / (fan_in + fan_out)) ** 0.5
    return std * jax.random.normal(key, shape, dtype=dtype)


if __name__ == "__main__":
    # Small shapes consistent with the module: batch=2, seq=16,
    # in_channels=8, out_channels=32.
    B, S, Cin, Cout = 2, 16, 8, 32

    key = jax.random.PRNGKey(0)
    kx, kw, kx2, kw2 = jax.random.split(key, 4)

    x = jax.random.normal(kx, (B, S, Cin), dtype=jnp.float32)
    weight = xavier_normal(kw, (Cout, Cin))
    bias = jnp.zeros((Cout,), jnp.float32)   # module init: zeros_

    ref = linear_reference(x, weight, bias)

    # Default path: bf16 MXU inputs + f32 accumulation, resident-W kernel,
    # weight prepared once (parameter-load time), output in x.dtype.
    params_bf16 = prepare_linear_params(weight, bias, matmul_dtype=jnp.bfloat16)
    out = jax.block_until_ready(linear_forward(x, params_bf16))
    assert out.shape == (B, S, Cout) and out.dtype == x.dtype
    assert jnp.allclose(out, ref, atol=3e-2, rtol=3e-2), "bf16 mismatch vs reference"

    # Bit-faithful opt-out: f32 MXU inputs.
    params_f32 = prepare_linear_params(weight, bias, matmul_dtype=jnp.float32)
    out_f32 = jax.block_until_ready(linear_forward(x, params_f32))
    assert jnp.allclose(out_f32, ref, atol=1e-4, rtol=1e-4), "f32 mismatch vs reference"

    # bias=False variant of the module.
    params_nb = prepare_linear_params(weight, None, matmul_dtype=jnp.float32)
    ref_nb = linear_reference(x, weight, None)
    out_nb = jax.block_until_ready(linear_forward(x, params_nb))
    assert jnp.allclose(out_nb, ref_nb, atol=1e-4, rtol=1e-4), "no-bias mismatch"

    # Exercise the large-weight K/N-tiled path (ragged M, padded Cout, tiled K).
    M2, Cin2, Cout2 = 777, 384, 300
    x_big = jax.random.normal(kx2, (M2, Cin2), dtype=jnp.float32)
    w_big = xavier_normal(kw2, (Cout2, Cin2))
    b_big = 0.1 * jnp.ones((Cout2,), jnp.float32)
    params_big = prepare_linear_params(w_big, b_big, matmul_dtype=jnp.bfloat16,
                                       force_tiled=True)
    ref_big = linear_reference(x_big, w_big, b_big)
    out_big = jax.block_until_ready(linear_forward(x_big, params_big))
    assert out_big.shape == (M2, Cout2) and out_big.dtype == x_big.dtype
    assert jnp.allclose(out_big, ref_big, atol=5e-2, rtol=5e-2), "tiled mismatch"

    print("KERNEL_OK")
</pallas_src>

<mosaic_0001>
module attributes {stable_mosaic.version = 11 : i64} {
  func.func @_linear_kernel_bias(%arg0: i32, %arg1: memref<16x8xbf16, #tpu.memory_space<vmem>>, %arg2: memref<8x128xbf16, #tpu.memory_space<vmem>>, %arg3: memref<1x128xf32, #tpu.memory_space<vmem>>, %arg4: memref<16x128xf32, #tpu.memory_space<vmem>>) attributes {dimension_semantics = [#tpu.dimension_semantics<parallel>], iteration_bounds = array<i64: 2>, scalar_prefetch = 0 : i64, scratch_operands = 0 : i64, tpu.core_type = #tpu.core_type<tc>, window_params = [{transform_indices = @transform_0, window_bounds = array<i64: 16, 8>}, {pipeline_mode = #tpu.pipeline_mode<synchronous>, transform_indices = @transform_1, window_bounds = array<i64: 8, 128>}, {pipeline_mode = #tpu.pipeline_mode<synchronous>, transform_indices = @transform_2, window_bounds = array<i64: 1, 128>}, {transform_indices = @transform_3, window_bounds = array<i64: 16, 128>}]} {
    %c0 = arith.constant 0 : index
    %c0_0 = arith.constant 0 : index
    %0 = vector.load %arg1[%c0, %c0_0] : memref<16x8xbf16, #tpu.memory_space<vmem>>, vector<16x8xbf16>
    %c0_1 = arith.constant 0 : index
    %c0_2 = arith.constant 0 : index
    %1 = vector.load %arg2[%c0_1, %c0_2] : memref<8x128xbf16, #tpu.memory_space<vmem>>, vector<8x128xbf16>
    %cst = arith.constant dense<0.000000e+00> : vector<16x128xf32>
    %2 = tpu.matmul %0, %1, %cst {dimension_numbers = #tpu.dot_dimension_numbers<[1], [0], [0], [1], [0, 0, 1, 1], [], []>} : vector<16x8xbf16>, vector<8x128xbf16>, vector<16x128xf32> -> vector<16x128xf32>
    %c0_3 = arith.constant 0 : index
    %c0_4 = arith.constant 0 : index
    %3 = vector.load %arg3[%c0_3, %c0_4] : memref<1x128xf32, #tpu.memory_space<vmem>>, vector<1x128xf32>
    %4 = vector.broadcast %3 : vector<1x128xf32> to vector<16x128xf32>
    %5 = arith.addf %2, %4 : vector<16x128xf32>
    %c0_5 = arith.constant 0 : index
    %c0_6 = arith.constant 0 : index
    %6 = vector.load %arg4[%c0_5, %c0_6] : memref<16x128xf32, #tpu.memory_space<vmem>>, vector<16x128xf32>
    tpu.vector_store %arg4[%c0_5, %c0_6], %5 {strides = array<i32>} : memref<16x128xf32, #tpu.memory_space<vmem>>, vector<16x128xf32>,
    return
  }
  func.func @transform_0(%arg0: i32) -> (i32, i32) {
    %c0_i32 = arith.constant 0 : i32
    %c0_i32_0 = arith.constant 0 : i32
    return %arg0, %c0_i32 : i32, i32
  }
  func.func @transform_1(%arg0: i32) -> (i32, i32) {
    %c0_i32 = arith.constant 0 : i32
    %c0_i32_0 = arith.constant 0 : i32
    %c0_i32_1 = arith.constant 0 : i32
    return %c0_i32, %c0_i32_0 : i32, i32
  }
  func.func @transform_2(%arg0: i32) -> (i32, i32) {
    %c0_i32 = arith.constant 0 : i32
    %c0_i32_0 = arith.constant 0 : i32
    %c0_i32_1 = arith.constant 0 : i32
    return %c0_i32, %c0_i32_0 : i32, i32
  }
  func.func @transform_3(%arg0: i32) -> (i32, i32) {
    %c0_i32 = arith.constant 0 : i32
    %c0_i32_0 = arith.constant 0 : i32
    return %arg0, %c0_i32 : i32, i32
  }
}

</mosaic_0001>

<bundles_post_ra>
// kernel: tpu_custom_call.1
= control target key start
LH: loop header
LB: loop body
LE: loop exit
PB: predicated region body
PF: predicated region fallthrough
CT: control target
= control target key end

     0   :  { %8 = vsyncpa [#allocation3], 0  ;;  %s580_s0 = inlined_call_operand.vmem [shape: bf16[32,8], index: 0, kind: input, shape index: {}]   ;;  %s581_s1 = inlined_call_operand.vmem [shape: bf16[8,128], index: 1, kind: input, shape index: {}]   ;;  %s582_s2 = inlined_call_operand.vmem [shape: f32[1,128], index: 2, kind: input, shape index: {}]   ;;  %s583_s3 = inlined_call_operand.hbm [shape: f32[32,128], index: 3, kind: output, shape index: {}]  }
   0x1   :  { %10 = vsyncpa [#allocation3 + $0x1], 0  ;;  %s472_s12 = smov 0   ;;  %s474_s13 = smov 0  }
   0x2   :  { %s476_s14 = smov 0   ;;  %s478_s15 = smov 0  }
   0x3 LB: > { %s493_s16 = sadd.s32 4294967295, %s445_s15   ;;  %s315_s17 = sadd.s32 4294967294, %s445_s15   ;;  %s445_s15 = sphi %s478_s15, %s589_s15   ;;  %s441_s14 = sphi %s476_s14, %s588_s14   ;;  %s437_s13 = sphi %s474_s13, %s587_s13   ;;  %s433_s12 = sphi %s472_s12, %s586_s12  }
   0x4   : > { %s497_s18 = sadd.s32 1, %s445_s15   ;;  %s91_s19 = sadd.s32 1, %s441_s14 }
   0x5   : > { %s88_s20 = ssub.s32 %s445_s15, %s497_s18  ;;  %p101_p0 = scmp.ne.s32.totalorder %s441_s14, %s437_s13 }
   0x6   : > { %p89_p1 = scmp.eq.s32.totalorder %s88_s20, 0  ;;  %p102_p2 = scmp.eq.s32.totalorder %s493_s16, 1 }
   0x7   : > { %p107_p3 = scmp.ne.s32.totalorder %s437_s13, %s433_s12  ;;  %p108_p4 = scmp.eq.s32.totalorder %s315_s17, 1 }
   0x8   : > { %s508_s21 = scalar_select %p89_p1, %s441_s14, %s91_s19  }
   0x9   : > { %p510_p5 = por %p102_p2, %p101_p0  ;;  %p514_p6 = por %p108_p4, %p107_p3 }
   0xa   : > { %p318_p7 = scmp.ge.s32.totalorder %s445_s15, 1  ;;  %p141_p8 = scmp.lt.s32.totalorder %s445_s15, 3 }
   0xc   : > { %p142_p9 = pnand %p318_p7, %p141_p8 }
   0xd   : > { %v175_v0 = vld [vmem:[%s581_s1] sm:$0xf] (!%p142_p9)  ;;  %vm192_vm0 = vcmask (!%p142_p9), 1043456   ;;  %s320_s26 = sshll.u32 (!%p142_p9), %s493_s16, 1  ;;  %v447_v1 = vmov (!%p142_p9), 0.0   ;;  %vm448_vm1 = vmmov (!%p142_p9), 0  }
   0xe   : > { %145 = sbr.rel (%p142_p9) target bundleno = 256 (0x100), region = 32  ;;  %333 = vmatprep.subr.bf16.mxu0 (!%p142_p9), %v447_v1  ;;  %v194_v2 = vsel (!%p142_p9), %vm192_vm0, %v175_v0, 0  ;;  %335 = vmatprep.mubr.msk.bf16.mxu0 (!%p142_p9), %vm448_vm1, %v447_v1  ;;  %p166_p10 = scmp.lt.s32.totalorder (!%p142_p9), %s320_s26, 3  ;;  %vm188_vm2 = vcmask (!%p142_p9), 64512   ;;  %v322_v4 = vld [vmem:[%s582_s2] ss:$0 sm:$0xff] (!%p142_p9) }
   0xf   : > { %334 = vmatpush3.bf16.msra.mxu0 (!%p142_p9), %v194_v2  ;;  %s162_s4 = sand.u32 (!%p142_p9), 1, %s437_s13   ;;  %s330_s10 = sshll.u32 (!%p142_p9), %s493_s16, 8 }
  0x10   : > { %s319_s5 = sshll.u32 (!%p142_p9), %s162_s4, 4  ;;  %s537_s19 = scalar_lea.hbm (!%p142_p9), %s583_s3, %s330_s10 }
  0x11   : > { %s164_s8 = scalar_lea.vmem (!%p142_p9), [#allocation2], %s319_s5  ;;  %s539_s20 = scalar_lea.sflag (!%p142_p9), [#allocation3], %s162_s4 }
  0x12   : > { %s253_s9 = sshll.u32 (!%p142_p9), %s164_s8, 4  ;;  %s449_s24 = smov (!%p142_p9), [#allocation2]   ;;  %s532_s9 = int_to_ptr.vmem [resolvable:$true] %s253_s9 }
  0x13   : > { %s383_s16 = scalar_lea.vmem (!%p142_p9), %s532_s9, 256  ;;  %s387_s25 = sshll.u32 (!%p142_p9), %s449_s24, 4  ;;  %s388_s25 = int_to_ptr.vmem [resolvable:$false] %s387_s25 }
  0x14   : > { %p384_p11 = scmp.ne.s32.totalorder (!%p142_p9), %s532_s9, %s383_s16  ;;  %p390_p0 = scmp.lt.s32.totalorder (!%p142_p9), %s532_s9, %s388_s25 }
  0x15   : > { %s591_s26 = smov (!%p166_p10, %s320_s26), 3 }
  0x16   : > { %s321_s27 = sshll.u32 %s591_s26, 2  ;;  %p385_p12 = pnand %p384_p11, %p510_p5 }
  0x17   : > { %s169_s30 = scalar_lea.vmem %s580_s0, %s321_s27  ;;  %s389_s26 = scalar_lea.vmem %s388_s25, 512 }
  0x18   : > { %v382_v3 = vld [vmem:[%s169_s30] sm:$0xff]   ;;  %p386_p13 = pneg %p385_p12  ;;  %p391_p1 = scmp.lt.s32.totalorder %s389_s26, %s383_s16 }
  0x19   : > { %336 = vmatmul.mubr.msk.bf16.vlgmr.msra.gmra.mrb[0].mxu0 %vm188_vm2, %v382_v3 }
  0x1a   : > { %p392_p2 = por %p391_p1, %p390_p0 }
  0x1c   : > { %p393_p3 = pnand %p392_p2, %p386_p13 }
  0xec   : > { %v230_v5 = vpop.f32.mrb[0].mxu0 }
  0xed   : > { %v231_v6 = vadd.f32 %v322_v4, %v230_v5  ;;  %v337_v7 = vpop.f32.mrb[1].mxu0 }
  0xee   : > { %v233_v8 = vpop.f32.mrb[2].mxu0 }
  0xef   : > { %237 = vst [vmem:[%s164_s8] sm:$0xff] %v231_v6  ;;  %v234_v9 = vadd.f32 %v322_v4, %v233_v8  ;;  %v338_v10 = vpop.f32.mrb[3].mxu0 }
  0xf1   : > { %238 = vst [vmem:[%s164_s8 + $0x8] sm:$0xff] %v234_v9 }
  0xf2   : > { %396 = shalt.err (!%p393_p3)
}
  0xf3   : > { %s397_s27 = scalar_lea.hbm %s537_s19, 256  ;;  %s401_s30 = scalar_lea.hbm %s583_s3, 512 }
  0xf4   : > { %p398_p4 = scmp.ne.s32.totalorder %s537_s19, %s397_s27  ;;  %p402_p9 = scmp.lt.u32.totalorder %s537_s19, %s583_s3 }
  0xf5   : > { %p403_p10 = scmp.lt.u32.totalorder %s401_s30, %s397_s27  ;;  %p405_p12 = scmp.lt.u32.totalorder %s397_s27, %s537_s19 }
  0xf6   : > { %p399_p7 = pnand %p398_p4, %p510_p5 }
  0xf7   : > { %p404_p11 = por %p403_p10, %p402_p9 }
  0xf8   : > { %p400_p8 = pneg %p399_p7 }
  0xf9   : > { %p406_p13 = por %p405_p12, %p404_p11 }
  0xfb   : > { %p407_p0 = pnand %p406_p13, %p400_p8 }
  0xfd   : > { %410 = shalt.err (!%p407_p0)
}
  0xfe   : > { %s450_s6 = smov 128   ;;  %s451_s7 = smov 8  }
  0xff   : > { %339 = dma.vmem_to_hbm [thread:$0]  (%p510_p5), %s532_s9, 256, %s537_s19, %s539_s20, %s450_s6, %s450_s6, %s451_s7  }
 0x100 PF: > { %p345_p1 = scmp.ge.s32.totalorder %s445_s15, 2  ;;  %s268_s8 = sand.u32 1, %s433_s12  }
 0x101   : > { %s269_s10 = scalar_lea.sflag [#allocation3], %s268_s8 }
 0x102   : > { %p342_p2 = pnand %p345_p1, %p514_p6 }
 0x104   : > { %428 = dma.done.wait (!%p342_p2), %s269_s10, 256  }
 0x105   : > { %430 = vsyncadd (!%p342_p2), %s269_s10, 4294967040  ;;  %p13_p3 = scmp.ge.s32.totalorder %s497_s18, 4   ;;  %s586_s12 = smov %s437_s13 }
 0x106   : > { %s587_s13 = smov %s441_s14  ;;  %s588_s14 = smov %s508_s21 }
 0x107   : > { %s589_s15 = smov %s497_s18  ;;  %15 = sbr.rel (!%p13_p3) target bundleno = 3 (0x3), region = 67 }
 0x10e   :  { %274 = vsyncpa [#allocation3], 1 }
 0x10f   :  { %276 = vsyncpa [#allocation3 + $0x1], 1 }

</bundles_post_ra>
